<compile_context>
chip_gen: v5e
topology: v5e:2x2
jax: 0.10.0
libtpu: 0.0.40
codegen_flags: <defaults>
</compile_context>

<pallas_src>
import jax
import jax.numpy as jnp
from jax.experimental import pallas as pl
from jax.experimental.pallas import tpu as pltpu


def mlp_kernel(x_ref, w1_ref, b1_ref, w2_ref, b2_ref, w3_ref, b3_ref, o_ref):
    # Load the (tb, 40) f32 batch tile, transpose so the batch sits on the
    # 128-lane axis (XLU, overlaps MXU), cast to bf16 in-kernel (no wrapper
    # cast pass over HBM).
    xt = x_ref[...].T.astype(jnp.bfloat16)                       # (40, tb)
    # Layer 1: (30, 40) @ (40, tb) -> (30, tb), f32 accumulation.
    h = jnp.dot(w1_ref[...], xt, preferred_element_type=jnp.float32)
    h = jnp.maximum(h + b1_ref[...], 0.0)
    # Layer 2: (20, 30) @ (30, tb) -> (20, tb)
    h = jnp.dot(w2_ref[...], h.astype(jnp.bfloat16),
                preferred_element_type=jnp.float32)
    h = jnp.maximum(h + b2_ref[...], 0.0)
    # Layer 3: (10, 20) @ (20, tb) -> (10, tb)
    h = jnp.dot(w3_ref[...], h.astype(jnp.bfloat16),
                preferred_element_type=jnp.float32)
    h = jnp.maximum(h + b3_ref[...], 0.0)
    o_ref[...] = h.astype(o_ref.dtype)                           # lane-dense store


def _pick_batch_tile(B: int) -> int:
    if B <= 512:
        return B  # single block: block dims == full array dims (no (8,128) issue)
    # Multiple of 128 (batch rides the lane axis), >= 2 grid steps for v7x's
    # second TensorCore, capped so padded per-step VMEM stays a few MiB on
    # every generation (v5e/v6e 128 MiB, v7x 64 MiB physical).
    tb = pl.cdiv(pl.cdiv(B, 2), 128) * 128
    return min(tb, 4096)


def net_forward(x, params):
    """x: (B, 40) f32.  Returns (B, 10) f32 (ReLU'd layer-3 activations)."""
    B = x.shape[0]
    tb = _pick_batch_tile(B)
    grid = (pl.cdiv(B, tb),)

    # Weights kept in PyTorch (out, in) layout -> used directly as matmul LHS.
    w1 = params["w1"].astype(jnp.bfloat16)   # (30, 40)
    w2 = params["w2"].astype(jnp.bfloat16)   # (20, 30)
    w3 = params["w3"].astype(jnp.bfloat16)   # (10, 20)
    b1, b2, b3 = params["b1"], params["b2"], params["b3"]   # (N, 1) f32

    def const(shape):
        # Constant index_map: block index never changes -> DMA'd once, resident.
        return pl.BlockSpec(shape, lambda i: (0, 0))

    out_t = pl.pallas_call(
        mlp_kernel,
        out_shape=jax.ShapeDtypeStruct((10, B), jnp.float32),
        grid=grid,
        in_specs=[
            pl.BlockSpec((tb, 40), lambda i: (i, 0)),   # x: batch-tiled, double-buffered
            const((30, 40)), const((30, 1)),            # w1, b1
            const((20, 30)), const((20, 1)),            # w2, b2
            const((10, 20)), const((10, 1)),            # w3, b3
        ],
        out_specs=pl.BlockSpec((10, tb), lambda i: (0, i)),
        compiler_params=pltpu.CompilerParams(
            dimension_semantics=("parallel",),          # shard batch over v7x's 2 TCs
            vmem_limit_bytes=32 * 1024 * 1024,
        ),
    )(x, w1, b1, w2, b2, w3, b3)
    # Kernel emits the lane-dense (10, B) layout; expose the module's (B, 10).
    # (Callers that can consume (10, B) directly should skip this transpose.)
    return out_t.T


def init_params(key):
    """Parameter init mirroring the PyTorch module.
    Weights in PyTorch (out_features, in_features) layout; biases (out, 1)."""
    k1, k2, k3, kb1, kb2, kb3 = jax.random.split(key, 6)

    def xavier_normal(k, fan_out, fan_in):
        std = (2.0 / (fan_in + fan_out)) ** 0.5
        return std * jax.random.normal(k, (fan_out, fan_in), jnp.float32)

    def kaiming_uniform(k, fan_out, fan_in):
        # PyTorch default Linear weight init: kaiming_uniform_(a=sqrt(5))
        # => bound = sqrt(1/fan_in)
        bound = (1.0 / fan_in) ** 0.5
        return jax.random.uniform(k, (fan_out, fan_in), jnp.float32, -bound, bound)

    def bias_uniform(k, fan_out, fan_in):
        bound = (1.0 / fan_in) ** 0.5
        return jax.random.uniform(k, (fan_out, 1), jnp.float32, -bound, bound)

    return {
        "w1": xavier_normal(k1, 30, 40),      # l1 weight: xavier_normal_
        "b1": bias_uniform(kb1, 30, 40),
        "w2": kaiming_uniform(k2, 20, 30),    # l2 weight: PyTorch default
        "b2": bias_uniform(kb2, 20, 30),
        "w3": kaiming_uniform(k3, 10, 20),    # l3 weight: PyTorch default
        "b3": bias_uniform(kb3, 10, 20),
    }


def ref_forward(x, params):
    """Pure-JAX reference with the same bf16-input / f32-accumulate arithmetic."""
    xb = x.astype(jnp.bfloat16)
    w1 = params["w1"].astype(jnp.bfloat16)
    w2 = params["w2"].astype(jnp.bfloat16)
    w3 = params["w3"].astype(jnp.bfloat16)
    h = jnp.dot(xb, w1.T, preferred_element_type=jnp.float32)
    h = jnp.maximum(h + params["b1"].T, 0.0)
    h = jnp.dot(h.astype(jnp.bfloat16), w2.T, preferred_element_type=jnp.float32)
    h = jnp.maximum(h + params["b2"].T, 0.0)
    h = jnp.dot(h.astype(jnp.bfloat16), w3.T, preferred_element_type=jnp.float32)
    return jnp.maximum(h + params["b3"].T, 0.0)


if __name__ == "__main__":
    key = jax.random.PRNGKey(0)
    kx, kx2, kp = jax.random.split(key, 3)
    params = init_params(kp)

    # Small single-block case.
    x_small = jax.random.normal(kx, (8, 40), jnp.float32)
    out_small = jax.block_until_ready(net_forward(x_small, params))
    ref_small = ref_forward(x_small, params)
    assert out_small.shape == (8, 10)
    assert jnp.allclose(out_small, ref_small, atol=1e-3, rtol=1e-3), (
        float(jnp.max(jnp.abs(out_small - ref_small))))

    # Multi-step grid with a partial last block (exercises the masking path
    # that replaced the wrapper-side pad/slice).
    x_big = jax.random.normal(kx2, (600, 40), jnp.float32)
    out_big = jax.block_until_ready(net_forward(x_big, params))
    ref_big = ref_forward(x_big, params)
    assert out_big.shape == (600, 10)
    assert jnp.allclose(out_big, ref_big, atol=1e-3, rtol=1e-3), (
        float(jnp.max(jnp.abs(out_big - ref_big))))

    print("KERNEL_OK")
</pallas_src>

<mosaic_0001>
module attributes {stable_mosaic.version = 11 : i64} {
  func.func @mlp_kernel(%arg0: i32, %arg1: memref<8x40xf32, #tpu.memory_space<vmem>>, %arg2: memref<30x40xbf16, #tpu.memory_space<vmem>>, %arg3: memref<30x1xf32, #tpu.memory_space<vmem>>, %arg4: memref<20x30xbf16, #tpu.memory_space<vmem>>, %arg5: memref<20x1xf32, #tpu.memory_space<vmem>>, %arg6: memref<10x20xbf16, #tpu.memory_space<vmem>>, %arg7: memref<10x1xf32, #tpu.memory_space<vmem>>, %arg8: memref<10x8xf32, #tpu.memory_space<vmem>>) attributes {dimension_semantics = [#tpu.dimension_semantics<parallel>], iteration_bounds = array<i64: 1>, scalar_prefetch = 0 : i64, scratch_operands = 0 : i64, tpu.core_type = #tpu.core_type<tc>, window_params = [{transform_indices = @transform_0, window_bounds = array<i64: 8, 40>}, {pipeline_mode = #tpu.pipeline_mode<synchronous>, transform_indices = @transform_1, window_bounds = array<i64: 30, 40>}, {pipeline_mode = #tpu.pipeline_mode<synchronous>, transform_indices = @transform_2, window_bounds = array<i64: 30, 1>}, {pipeline_mode = #tpu.pipeline_mode<synchronous>, transform_indices = @transform_3, window_bounds = array<i64: 20, 30>}, {pipeline_mode = #tpu.pipeline_mode<synchronous>, transform_indices = @transform_4, window_bounds = array<i64: 20, 1>}, {pipeline_mode = #tpu.pipeline_mode<synchronous>, transform_indices = @transform_5, window_bounds = array<i64: 10, 20>}, {pipeline_mode = #tpu.pipeline_mode<synchronous>, transform_indices = @transform_6, window_bounds = array<i64: 10, 1>}, {transform_indices = @transform_7, window_bounds = array<i64: 10, 8>}]} {
    %c0 = arith.constant 0 : index
    %c0_0 = arith.constant 0 : index
    %0 = vector.load %arg1[%c0, %c0_0] : memref<8x40xf32, #tpu.memory_space<vmem>>, vector<8x40xf32>
    %1 = tpu.transpose %0, [1, 0] : vector<8x40xf32> -> vector<40x8xf32>
    %2 = arith.truncf %1 : vector<40x8xf32> to vector<40x8xbf16>
    %c0_1 = arith.constant 0 : index
    %c0_2 = arith.constant 0 : index
    %3 = vector.load %arg2[%c0_1, %c0_2] : memref<30x40xbf16, #tpu.memory_space<vmem>>, vector<30x40xbf16>
    %cst = arith.constant dense<0.000000e+00> : vector<30x8xf32>
    %4 = tpu.matmul %3, %2, %cst {dimension_numbers = #tpu.dot_dimension_numbers<[1], [0], [0], [1], [0, 0, 1, 1], [], []>} : vector<30x40xbf16>, vector<40x8xbf16>, vector<30x8xf32> -> vector<30x8xf32>
    %c0_3 = arith.constant 0 : index
    %c0_4 = arith.constant 0 : index
    %5 = vector.load %arg3[%c0_3, %c0_4] : memref<30x1xf32, #tpu.memory_space<vmem>>, vector<30x1xf32>
    %6 = vector.broadcast %5 : vector<30x1xf32> to vector<30x8xf32>
    %7 = arith.addf %4, %6 : vector<30x8xf32>
    %cst_5 = arith.constant 0.000000e+00 : f32
    %8 = vector.broadcast %cst_5 : f32 to vector<30x8xf32>
    %9 = arith.maximumf %7, %8 : vector<30x8xf32>
    %c0_6 = arith.constant 0 : index
    %c0_7 = arith.constant 0 : index
    %10 = vector.load %arg4[%c0_6, %c0_7] : memref<20x30xbf16, #tpu.memory_space<vmem>>, vector<20x30xbf16>
    %11 = arith.truncf %9 : vector<30x8xf32> to vector<30x8xbf16>
    %cst_8 = arith.constant dense<0.000000e+00> : vector<20x8xf32>
    %12 = tpu.matmul %10, %11, %cst_8 {dimension_numbers = #tpu.dot_dimension_numbers<[1], [0], [0], [1], [0, 0, 1, 1], [], []>} : vector<20x30xbf16>, vector<30x8xbf16>, vector<20x8xf32> -> vector<20x8xf32>
    %c0_9 = arith.constant 0 : index
    %c0_10 = arith.constant 0 : index
    %13 = vector.load %arg5[%c0_9, %c0_10] : memref<20x1xf32, #tpu.memory_space<vmem>>, vector<20x1xf32>
    %14 = vector.broadcast %13 : vector<20x1xf32> to vector<20x8xf32>
    %15 = arith.addf %12, %14 : vector<20x8xf32>
    %cst_11 = arith.constant 0.000000e+00 : f32
    %16 = vector.broadcast %cst_11 : f32 to vector<20x8xf32>
    %17 = arith.maximumf %15, %16 : vector<20x8xf32>
    %c0_12 = arith.constant 0 : index
    %c0_13 = arith.constant 0 : index
    %18 = vector.load %arg6[%c0_12, %c0_13] : memref<10x20xbf16, #tpu.memory_space<vmem>>, vector<10x20xbf16>
    %19 = arith.truncf %17 : vector<20x8xf32> to vector<20x8xbf16>
    %cst_14 = arith.constant dense<0.000000e+00> : vector<10x8xf32>
    %20 = tpu.matmul %18, %19, %cst_14 {dimension_numbers = #tpu.dot_dimension_numbers<[1], [0], [0], [1], [0, 0, 1, 1], [], []>} : vector<10x20xbf16>, vector<20x8xbf16>, vector<10x8xf32> -> vector<10x8xf32>
    %c0_15 = arith.constant 0 : index
    %c0_16 = arith.constant 0 : index
    %21 = vector.load %arg7[%c0_15, %c0_16] : memref<10x1xf32, #tpu.memory_space<vmem>>, vector<10x1xf32>
    %22 = vector.broadcast %21 : vector<10x1xf32> to vector<10x8xf32>
    %23 = arith.addf %20, %22 : vector<10x8xf32>
    %cst_17 = arith.constant 0.000000e+00 : f32
    %24 = vector.broadcast %cst_17 : f32 to vector<10x8xf32>
    %25 = arith.maximumf %23, %24 : vector<10x8xf32>
    %c0_18 = arith.constant 0 : index
    %c0_19 = arith.constant 0 : index
    %26 = vector.load %arg8[%c0_18, %c0_19] : memref<10x8xf32, #tpu.memory_space<vmem>>, vector<10x8xf32>
    tpu.vector_store %arg8[%c0_18, %c0_19], %25 {strides = array<i32>} : memref<10x8xf32, #tpu.memory_space<vmem>>, vector<10x8xf32>,
    return
  }
  func.func @transform_0(%arg0: i32) -> (i32, i32) {
    %c0_i32 = arith.constant 0 : i32
    %c0_i32_0 = arith.constant 0 : i32
    return %arg0, %c0_i32 : i32, i32
  }
  func.func @transform_1(%arg0: i32) -> (i32, i32) {
    %c0_i32 = arith.constant 0 : i32
    %c0_i32_0 = arith.constant 0 : i32
    %c0_i32_1 = arith.constant 0 : i32
    return %c0_i32, %c0_i32_0 : i32, i32
  }
  func.func @transform_2(%arg0: i32) -> (i32, i32) {
    %c0_i32 = arith.constant 0 : i32
    %c0_i32_0 = arith.constant 0 : i32
    %c0_i32_1 = arith.constant 0 : i32
    return %c0_i32, %c0_i32_0 : i32, i32
  }
  func.func @transform_3(%arg0: i32) -> (i32, i32) {
    %c0_i32 = arith.constant 0 : i32
    %c0_i32_0 = arith.constant 0 : i32
    %c0_i32_1 = arith.constant 0 : i32
    return %c0_i32, %c0_i32_0 : i32, i32
  }
  func.func @transform_4(%arg0: i32) -> (i32, i32) {
    %c0_i32 = arith.constant 0 : i32
    %c0_i32_0 = arith.constant 0 : i32
    %c0_i32_1 = arith.constant 0 : i32
    return %c0_i32, %c0_i32_0 : i32, i32
  }
  func.func @transform_5(%arg0: i32) -> (i32, i32) {
    %c0_i32 = arith.constant 0 : i32
    %c0_i32_0 = arith.constant 0 : i32
    %c0_i32_1 = arith.constant 0 : i32
    return %c0_i32, %c0_i32_0 : i32, i32
  }
  func.func @transform_6(%arg0: i32) -> (i32, i32) {
    %c0_i32 = arith.constant 0 : i32
    %c0_i32_0 = arith.constant 0 : i32
    %c0_i32_1 = arith.constant 0 : i32
    return %c0_i32, %c0_i32_0 : i32, i32
  }
  func.func @transform_7(%arg0: i32) -> (i32, i32) {
    %c0_i32 = arith.constant 0 : i32
    %c0_i32_0 = arith.constant 0 : i32
    return %c0_i32, %arg0 : i32, i32
  }
}

</mosaic_0001>

<bundles_post_ra>
// kernel: tpu_custom_call.1
= control target key start
LH: loop header
LB: loop body
LE: loop exit
PB: predicated region body
PF: predicated region fallthrough
CT: control target
= control target key end

     0   :  { %v284_v3 = vmov 0   ;;  %vm108_vm0 = vcmask 1043456   ;;  %vm101_vm1 = vcmask 326656   ;;  %vm173_vm2 = vcmask 1046528   ;;  %s382_s0 = inlined_call_operand.vmem [shape: f32[8,40], index: 0, kind: input, shape index: {}]   ;;  %s383_s2 = inlined_call_operand.vmem [shape: f32[30,1], index: 2, kind: input, shape index: {}]   ;;  %s384_s4 = inlined_call_operand.vmem [shape: f32[20,1], index: 4, kind: input, shape index: {}]   ;;  %s385_s6 = inlined_call_operand.vmem [shape: f32[10,1], index: 6, kind: input, shape index: {}]   ;;  %s386_s1 = inlined_call_operand.vmem [shape: bf16[30,40], index: 1, kind: input, shape index: {}]   ;;  %s387_s3 = inlined_call_operand.vmem [shape: bf16[20,30], index: 3, kind: input, shape index: {}]   ;;  %s388_s5 = inlined_call_operand.vmem [shape: bf16[10,20], index: 5, kind: input, shape index: {}]   ;;  %s389_s7 = inlined_call_operand.vmem [shape: f32[10,8], index: 7, kind: output, shape index: {}]  }
   0x1   :  { %v27_v0 = vld [vmem:[%s382_s0] sm:$0xff]  ;;  %282 = vset.pattern.permute.xlu1 %v284_v3  ;;  %283 = vset.pattern.permute.xlu2 %v284_v3  ;;  %v70_v4 = vld [vmem:[%s383_s2 + $0x18] sm:$0x3f]  ;;  %v69_v6 = vld [vmem:[%s383_s2 + $0x10] sm:$0xff]  ;;  %vm166_vm3 = vcmask 244736   ;;  %vm223_vm4 = vcmask 1041408  }
   0x2   :  { %28 = vxpose.xlu0.b32.start.end [1/1] (short) (narrow) %v27_v0, 40  ;;  %88 = vperm.xlu1 %282, %v70_v4   ;;  %v68_v7 = vld [vmem:[%s383_s2 + $0x8] sm:$0xff]  ;;  %v67_v8 = vld [vmem:[%s383_s2] sm:$0xff]  ;;  %v142_v9 = vld [vmem:[%s384_s4 + $0x10] sm:$0xf]  ;;  %vm219_vm5 = vcmask 162816  }
   0x3   :  { %78 = vperm.xlu2 %283, %v68_v7   ;;  %v140_v11 = vld [vmem:[%s384_s4] sm:$0xff]  ;;  %v141_v12 = vld [vmem:[%s384_s4 + $0x8] sm:$0xff]  ;;  %vm243_vm6 = vcmask 64512   ;;  %vm245_vm7 = vcmask 58368  }
   0x4   :  { %v202_v15 = vld [vmem:[%s385_s6] sm:$0xff]  ;;  %v203_v18 = vld [vmem:[%s385_s6 + $0x8] sm:$0x3]  ;;  %v273_v20 = vld [vmem:[%s386_s1 + $0x8] sm:$0x70] }
   0x5   :  { %v257_v19 = vld [vmem:[%s386_s1 + $0x8] sm:$0xf]  ;;  %v272_v23 = vld [vmem:[%s386_s1] sm:$0xff] }
   0x6   :  { %v258_v22 = vor.u32 %v273_v20, %v257_v19  ;;  %v274_v43 = vld [vmem:[%s387_s3] sm:$0xff]  ;;  %v137_v44 = vld [vmem:[%s387_s3 + $0x8] sm:$0x3] }
   0x7   :  { %v163_v45 = vunpack.c.l.b16 %v137_v44  ;;  %v269_v62 = vld [vmem:[%s388_s5] sm:$0xf]  ;;  %v275_v63 = vld [vmem:[%s388_s5] sm:$0x10] }
   0x9   :  { %v165_v46 = vpack.c.b16 %v163_v45, %v163_v45 }
   0xa   :  { %73 = vperm.xlu1 %282, %v67_v8  }
   0xb   :  { %155 = vperm.xlu2 %283, %v142_v9  }
  0x12   :  { %145 = vperm.xlu1 %282, %v140_v11  }
  0x13   :  { %150 = vperm.xlu2 %283, %v141_v12  }
  0x1a   :  { %206 = vperm.xlu1 %282, %v202_v15  }
  0x1b   :  { %211 = vperm.xlu2 %283, %v203_v18  }
  0x5d   :  { %v79_v31 = vpop.permute.xlu2 %78 }
  0x65   :  { %v156_v48 = vpop.permute.xlu2 %155 }
  0x69   :  { %281 = vset.pattern.permute.xlu0 %v284_v3 }
  0x6d   :  { %v151_v51 = vpop.permute.xlu2 %150 }
  0x74   :  { %v89_v25 = vpop.permute.xlu1 %88 }
  0x7c   :  { %v74_v32 = vpop.permute.xlu1 %73 }
  0x84   :  { %v146_v54 = vpop.permute.xlu1 %145 }
  0x90   :  { %83 = vperm.xlu0 %281, %v69_v6   ;;  %v212_v6 = vpop.permute.xlu2 %211 }
  0xa6   :  { %v44_v1 = vpop.trf.xlu0 }
  0xae   :  { %v45_v2 = vpop.trf.xlu0 }
  0xaf   :  { %v60_v21 = vpack.c.bf16 %v45_v2, %v44_v1  ;;  %v270_v1 = vor.u32 %v275_v63, %v269_v62  ;;  %v207_v2 = vpop.permute.xlu1 %206 }
  0xb6   :  { %v46_v5 = vpop.trf.xlu0 }
  0xbe   :  { %v47_v10 = vpop.trf.xlu0 }
  0xbf   :  { %v61_v17 = vpack.c.bf16 %v47_v10, %v46_v5 }
  0xc6   :  { %v48_v13 = vpop.trf.xlu0 }
  0xc7   :  { %v62_v14 = vpack.c.bf16 %v48_v13, %v48_v13 }
  0xc9   :  { %v110_v16 = vsel %vm108_vm0, %v62_v14, 0 }
  0xca   :  { %117 = vmatpush.bf16.msra.mxu0 %v110_v16  ;;  %276 = vmatpush.bf16.msra.mxu3 %v110_v16 }
  0xce   :  { %118 = vmatpush.bf16.msra.mxu0 %v61_v17  ;;  %277 = vmatpush.bf16.msra.mxu3 %v61_v17 }
  0xd2   :  { %119 = vmatpush.bf16.msra.mxu0 %v60_v21  ;;  %278 = vmatpush.bf16.msra.mxu3 %v60_v21 }
  0xd5   :  { %260 = vmatmul.msk.bf16.vlgmr.msra.gmra.mxu3 %vm101_vm1, %v258_v22  ;;  %259 = vmatmul.msk.bf16.vlgmr.msra.gmra.mxu0 %vm101_vm1, %v272_v23 }
 0x102   :  { %v84_v27 = vpop.permute.xlu0 %83 }
 0x152   :  { %v121_v24 = vpop.f32.mrf.mxu0 }
 0x153   :  { %v122_v34 = vadd.f32 %v121_v24, %v74_v32 }
 0x155   :  { %v131_v39 = vmax.f32 %v122_v34, 0.0 }
 0x158   :  { %v126_v26 = vpop.f32.mrf.mxu3 }
 0x159   :  { %v127_v28 = vadd.f32 %v126_v26, %v84_v27 }
 0x15a   :  { %v123_v29 = vpop.f32.mrf.mxu0 }
 0x15b   :  { %v124_v35 = vadd.f32 %v123_v29, %v79_v31  ;;  %v133_v36 = vmax.f32 %v127_v28, 0.0 }
 0x15d   :  { %v132_v40 = vmax.f32 %v124_v35, 0.0 }
 0x15f   :  { %v138_v42 = vpack.c.bf16 %v132_v40, %v131_v39 }
 0x160   :  { %v128_v30 = vpop.f32.mrf.mxu3 }
 0x161   :  { %v129_v33 = vadd.f32 %v128_v30, %v89_v25 }
 0x163   :  { %v134_v37 = vmax.f32 %v129_v33, 0.0 }
 0x165   :  { %v139_v38 = vpack.c.bf16 %v134_v37, %v133_v36 }
 0x167   :  { %v175_v41 = vsel %vm173_vm2, %v139_v38, 0 }
 0x168   :  { %183 = vmatpush.bf16.msra.mxu1 %v175_v41 }
 0x16c   :  { %184 = vmatpush.bf16.msra.mxu1 %v138_v42 }
 0x16f   :  { %265 = vmatmul.msk.bf16.vlgmr.msra.gmra.mxu1 %vm166_vm3, %v274_v43 }
 0x17f   :  { %266 = vmatmul.msk.bf16.gmra.mxu1 %vm166_vm3, %v165_v46 }
 0x1ec   :  { %v186_v47 = vpop.f32.mrf.mxu1 }
 0x1ed   :  { %v187_v56 = vadd.f32 %v186_v47, %v146_v54 }
 0x1ef   :  { %v195_v60 = vmax.f32 %v187_v56, 0.0 }
 0x1f4   :  { %v188_v49 = vpop.f32.mrf.mxu1 }
 0x1f5   :  { %v189_v53 = vadd.f32 %v188_v49, %v151_v51 }
 0x1f7   :  { %v196_v58 = vmax.f32 %v189_v53, 0.0 }
 0x1f9   :  { %v200_v0 = vpack.c.bf16 %v196_v58, %v195_v60 }
 0x1fc   :  { %v191_v50 = vpop.f32.mrf.mxu1 }
 0x1fd   :  { %v192_v52 = vadd.f32 %v191_v50, %v156_v48 }
 0x1ff   :  { %v197_v55 = vmax.f32 %v192_v52, 0.0 }
 0x201   :  { %v201_v57 = vpack.c.bf16 %v197_v55, %v197_v55 }
 0x203   :  { %v225_v59 = vsel %vm223_vm4, %v201_v57, 0 }
 0x204   :  { %v193_v61 = vpop.f32.mrf.mxu1  ;;  %233 = vmatpush.bf16.msra.mxu2 %v225_v59 }
 0x208   :  { %234 = vmatpush.bf16.msra.mxu2 %v200_v0 }
 0x20b   :  { %271 = vmatmul.msk.bf16.vlgmr.msra.gmra.mxu2 %vm219_vm5, %v270_v1 }
 0x28e   :  { %v236_v3 = vpop.f32.mrf.mxu2 }
 0x28f   :  { %v237_v4 = vadd.f32 %v236_v3, %v207_v2 }
 0x291   :  { %v241_v5 = vmax.f32 %v237_v4, 0.0 }
 0x293   :  { %244 = vst.msk [vmem:[%s389_s7] sm:$0xff] %vm243_vm6, %v241_v5 }
 0x296   :  { %v238_v7 = vpop.f32.mrf.mxu2 }
 0x297   :  { %v239_v8 = vadd.f32 %v238_v7, %v212_v6 }
 0x299   :  { %v242_v9 = vmax.f32 %v239_v8, 0.0 }
 0x29b   :  { %246 = vst.msk [vmem:[%s389_s7 + $0x8] sm:$0x3] %vm245_vm7, %v242_v9 }

</bundles_post_ra>
